<compile_context>
chip_gen: v7x
topology: tpu7x:2x2x1
jax: 0.10.0
libtpu: 0.0.40
codegen_flags: <defaults>
</compile_context>

<pallas_src>
import jax
import jax.numpy as jnp
from jax import lax
from jax.experimental import pallas as pl
from jax.experimental.pallas import tpu as pltpu


# ----------------------------- Pallas kernel --------------------------------
def meu_kernel(xl_ref, xh_ref, wl_ref, bl_ref, wh_ref, bh_ref,
               wca_ref, ah_ref, awt_ref, out_ref, t_sc, ca_sc):
    c_out, tile_hw = out_ref.shape            # (C_out, th*w)
    th, hh = ah_ref.shape                     # (th, Hh)
    wh_in, w = awt_ref.shape                  # (Wh, w)

    # ---- High path: computed once per image (first row tile), cached. -------
    @pl.when(pl.program_id(1) == 0)
    def _():
        xh = xh_ref[...].astype(jnp.float32)                      # (C_high, HWh)
        # folded conv1x1_high + bn_high
        yh = jnp.dot(wh_ref[...], xh,
                     preferred_element_type=jnp.float32) + bh_ref[...]   # (C_out, HWh)
        # channel attention: sigmoid(relu(ca_conv(global avg pool)))
        avg = jnp.mean(yh, axis=1, keepdims=True)                 # (C_out, 1)
        ca_pre = jnp.dot(wca_ref[...], avg, preferred_element_type=jnp.float32)
        ca_sc[...] = jax.nn.sigmoid(jnp.maximum(ca_pre, 0.0))     # (C_out, 1)
        # width stage of the separable bilinear upsample (tile-independent)
        yh3 = yh.reshape(c_out, hh, wh_in)                        # (C_out, Hh, Wh)
        awt_b = jnp.broadcast_to(awt_ref[...], (c_out, wh_in, w))
        t_sc[...] = lax.dot_general(yh3, awt_b, (((2,), (1,)), ((0,), (0,))),
                                    preferred_element_type=jnp.float32)  # (C_out, Hh, w)

    # ---- Low path on this row tile. -----------------------------------------
    # bf16 on the wire, f32 in-register.
    xl = xl_ref[...].astype(jnp.float32)                          # (C_low, th*w)
    # folded conv1x1_low + bn_low.  Row c_out of the weight/bias is the fused
    # (wsa * channel-mean) row, i.e. the spatial-attention pre-activation.
    yl_ext = jnp.dot(wl_ref[...], xl,
                     preferred_element_type=jnp.float32) + bl_ref[...]   # (C_out+1, th*w)
    yl = yl_ext[:c_out]                                           # (C_out, th*w)
    sa = jax.nn.sigmoid(yl_ext[c_out:])                           # (1, th*w)

    # height stage of the upsample, restricted to this tile's rows of Ah
    ah_b = jnp.broadcast_to(ah_ref[...], (c_out, th, hh))         # (C_out, th, Hh)
    up3 = lax.dot_general(ah_b, t_sc[...], (((2,), (1,)), ((0,), (0,))),
                          preferred_element_type=jnp.float32)     # (C_out, th, w)

    out_ref[...] = ca_sc[...] * yl + sa * up3.reshape(c_out, tile_hw)


# ------------------------------ glue / wrapper -------------------------------
def _interp_matrix(out_size, in_size):
    """Bilinear (align_corners=True) interpolation weights, shape (out, in)."""
    if in_size == 1:
        return jnp.ones((out_size, 1), jnp.float32)
    if out_size == 1:
        return jax.nn.one_hot(jnp.array([0]), in_size, dtype=jnp.float32)
    coords = jnp.arange(out_size, dtype=jnp.float32) * (in_size - 1) / (out_size - 1)
    i0 = jnp.clip(jnp.floor(coords).astype(jnp.int32), 0, in_size - 1)
    i1 = jnp.minimum(i0 + 1, in_size - 1)
    frac = coords - i0.astype(jnp.float32)
    return (jax.nn.one_hot(i0, in_size, dtype=jnp.float32) * (1.0 - frac)[:, None]
            + jax.nn.one_hot(i1, in_size, dtype=jnp.float32) * frac[:, None])


def fold_bn(conv_w, gamma, beta, mean, var, eps=1e-5):
    """Fold eval-mode BatchNorm into a bias-free 1x1 conv. conv_w: (C_out, C_in)."""
    scale = gamma / jnp.sqrt(var + eps)
    return conv_w * scale[:, None], beta - mean * scale        # (C_out,C_in), (C_out,)


def pack_params(w_low, w_high, w_sa, w_ca,
                g_lo, b_lo, m_lo, v_lo, g_hi, b_hi, m_hi, v_hi, eps=1e-5):
    """Fold BN and fuse the spatial-attention scalar path into the low matmul."""
    wl, bl = fold_bn(w_low, g_lo, b_lo, m_lo, v_lo, eps)       # (C_out,C_low), (C_out,)
    whi, bhi = fold_bn(w_high, g_hi, b_hi, m_hi, v_hi, eps)    # (C_out,C_high), (C_out,)
    wsa = w_sa.reshape(()).astype(jnp.float32)                 # sa_conv is a scalar mult
    sa_row = wsa * jnp.mean(wl, axis=0, keepdims=True)         # (1, C_low)
    sa_bias = wsa * jnp.mean(bl, keepdims=True)                # (1,)
    return dict(
        wl_ext=jnp.concatenate([wl, sa_row], axis=0).astype(jnp.float32),        # (C_out+1, C_low)
        bl_ext=jnp.concatenate([bl, sa_bias], axis=0)[:, None].astype(jnp.float32),  # (C_out+1, 1)
        wh=whi.astype(jnp.float32),                            # (C_out, C_high)
        bh=bhi[:, None].astype(jnp.float32),                   # (C_out, 1)
        wca=w_ca.astype(jnp.float32),                          # (C_out, C_out)
    )


def _pick_row_tile(h, w, max_tile_cols=32 * 1024):
    """Largest row tile th dividing h with th*w lane-aligned and VMEM-friendly."""
    for th in range(h, 0, -1):
        if h % th == 0 and (th * w) % 128 == 0 and th * w <= max_tile_cols:
            return th
    return h  # fall back to a single full tile (block == full array is legal)


def meu_forward(fms_high, fms_low, params, row_tile=None):
    """fms_high: (B, C_high, Hh, Wh) NCHW, fms_low: (B, C_low, h, w) NCHW."""
    B, C_low, h, w = fms_low.shape
    _, C_high, Hh, Wh = fms_high.shape
    C_out = params["wh"].shape[0]
    HW, HWh = h * w, Hh * Wh

    th = row_tile if row_tile is not None else _pick_row_tile(h, w)
    assert h % th == 0, "row tile must divide h"
    assert (th * w) % 128 == 0 or th == h, "row tile must keep the lane dim dense"
    n_tiles = h // th
    TW = th * w

    # NCHW is already channels-first: flattening spatial dims is a free view.
    # Activations go over HBM->VMEM in bf16; all math inside the kernel is f32.
    xl = fms_low.reshape(B, C_low, HW).astype(jnp.bfloat16)
    xh = fms_high.reshape(B, C_high, HWh).astype(jnp.bfloat16)

    ah = _interp_matrix(h, Hh)            # (h, Hh)
    awt = _interp_matrix(w, Wh).T         # (Wh, w)

    out_flat = pl.pallas_call(
        meu_kernel,
        out_shape=jax.ShapeDtypeStruct((B, C_out, HW), jnp.float32),
        grid_spec=pltpu.PrefetchScalarGridSpec(
            num_scalar_prefetch=0,
            grid=(B, n_tiles),
            in_specs=[
                pl.BlockSpec((None, C_low, TW), lambda b, i: (b, 0, i)),
                pl.BlockSpec((None, C_high, HWh), lambda b, i: (b, 0, 0)),
                pl.BlockSpec((C_out + 1, C_low), lambda b, i: (0, 0)),
                pl.BlockSpec((C_out + 1, 1), lambda b, i: (0, 0)),
                pl.BlockSpec((C_out, C_high), lambda b, i: (0, 0)),
                pl.BlockSpec((C_out, 1), lambda b, i: (0, 0)),
                pl.BlockSpec((C_out, C_out), lambda b, i: (0, 0)),
                pl.BlockSpec((th, Hh), lambda b, i: (i, 0)),
                pl.BlockSpec((Wh, w), lambda b, i: (0, 0)),
            ],
            out_specs=pl.BlockSpec((None, C_out, TW), lambda b, i: (b, 0, i)),
            scratch_shapes=[
                pltpu.VMEM((C_out, Hh, w), jnp.float32),   # width-interp'd high path
                pltpu.VMEM((C_out, 1), jnp.float32),       # channel attention
            ],
        ),
        compiler_params=pltpu.CompilerParams(
            dimension_semantics=("parallel", "arbitrary")),
    )(xl, xh, params["wl_ext"], params["bl_ext"], params["wh"], params["bh"],
      params["wca"], ah, awt)

    # (B, C_out, HW) -> NCHW is again a free reshape.
    return out_flat.reshape(B, C_out, h, w)


def meu_reference(fms_high, fms_low, raw):
    """Pure-JAX mirror of the PyTorch MEUModule.forward (eval-mode BN)."""
    B, C_low, h, w = fms_low.shape
    eps = 1e-5
    # Same bf16 rounding of the activations as the kernel path.
    xl = fms_low.astype(jnp.bfloat16).astype(jnp.float32)
    xh = fms_high.astype(jnp.bfloat16).astype(jnp.float32)

    def conv1x1(x, wmat):
        return jnp.einsum('oc,bchw->bohw', wmat, x)

    def bn(x, g, b, m, v):
        inv = g / jnp.sqrt(v + eps)
        return x * inv[None, :, None, None] + (b - m * inv)[None, :, None, None]

    lo = bn(conv1x1(xl, raw["w_low"]), raw["g_lo"], raw["b_lo"], raw["m_lo"], raw["v_lo"])
    sa = jax.nn.sigmoid(jnp.mean(lo, axis=1, keepdims=True) * raw["w_sa"][0, 0])
    hi = bn(conv1x1(xh, raw["w_high"]), raw["g_hi"], raw["b_hi"], raw["m_hi"], raw["v_hi"])
    avg = jnp.mean(hi, axis=(2, 3), keepdims=True)
    ca = jax.nn.sigmoid(jnp.maximum(
        jnp.einsum('oc,bcij->boij', raw["w_ca"], avg), 0.0))
    Ah = _interp_matrix(h, hi.shape[2])
    Aw = _interp_matrix(w, hi.shape[3])
    hi_up = jnp.einsum('yi,xj,bcij->bcyx', Ah, Aw, hi)
    return ca * lo + sa * hi_up


# --------------------------------- main --------------------------------------
if __name__ == "__main__":
    B = 2
    C_high, C_low, C_out = 8, 4, 8
    h, w = 16, 16          # low-level (target) spatial size
    Hh, Wh = 8, 8          # high-level spatial size

    key = jax.random.PRNGKey(0)
    ks = jax.random.split(key, 16)

    # inputs (PyTorch NCHW convention)
    fms_high = jax.random.normal(ks[0], (B, C_high, Hh, Wh), jnp.float32)
    fms_low = jax.random.normal(ks[1], (B, C_low, h, w), jnp.float32)

    # synthetic module parameters (1x1 conv weights are (C_out, C_in); bias=False)
    w_low = jax.random.normal(ks[2], (C_out, C_low), jnp.float32) * 0.2
    w_high = jax.random.normal(ks[3], (C_out, C_high), jnp.float32) * 0.2
    w_sa = jax.random.normal(ks[4], (1, 1), jnp.float32) * 0.5
    w_ca = jax.random.normal(ks[5], (C_out, C_out), jnp.float32) * 0.2

    # eval-mode BatchNorm parameters
    g_lo = 1.0 + 0.1 * jax.random.normal(ks[6], (C_out,), jnp.float32)
    b_lo = 0.1 * jax.random.normal(ks[7], (C_out,), jnp.float32)
    m_lo = 0.05 * jax.random.normal(ks[8], (C_out,), jnp.float32)
    v_lo = 1.0 + 0.1 * jax.random.uniform(ks[9], (C_out,), jnp.float32)
    g_hi = 1.0 + 0.1 * jax.random.normal(ks[10], (C_out,), jnp.float32)
    b_hi = 0.1 * jax.random.normal(ks[11], (C_out,), jnp.float32)
    m_hi = 0.05 * jax.random.normal(ks[12], (C_out,), jnp.float32)
    v_hi = 1.0 + 0.1 * jax.random.uniform(ks[13], (C_out,), jnp.float32)

    params = pack_params(w_low, w_high, w_sa, w_ca,
                         g_lo, b_lo, m_lo, v_lo, g_hi, b_hi, m_hi, v_hi)

    raw = dict(w_low=w_low, w_high=w_high, w_sa=w_sa, w_ca=w_ca,
               g_lo=g_lo, b_lo=b_lo, m_lo=m_lo, v_lo=v_lo,
               g_hi=g_hi, b_hi=b_hi, m_hi=m_hi, v_hi=v_hi)
    ref = meu_reference(fms_high, fms_low, raw)

    # Tiled path (2 row tiles of 8 rows each -> 128-lane tiles).
    out_tiled = jax.block_until_ready(meu_forward(fms_high, fms_low, params, row_tile=8))
    # Untiled path (single full-HW tile per image).
    out_full = jax.block_until_ready(meu_forward(fms_high, fms_low, params))

    assert out_tiled.shape == (B, C_out, h, w)
    assert out_full.shape == (B, C_out, h, w)
    err_t = jnp.max(jnp.abs(out_tiled - ref))
    err_f = jnp.max(jnp.abs(out_full - ref))
    assert jnp.allclose(out_tiled, ref, atol=1e-3, rtol=1e-3), (
        f"tiled kernel mismatch vs JAX reference, max abs err = {err_t}")
    assert jnp.allclose(out_full, ref, atol=1e-3, rtol=1e-3), (
        f"untiled kernel mismatch vs JAX reference, max abs err = {err_f}")

    print("KERNEL_OK")
</pallas_src>

<mosaic_0001>
module attributes {stable_mosaic.version = 11 : i64} {
  func.func @meu_kernel(%arg0: i32, %arg1: i32, %arg2: memref<1x4x128xbf16, #tpu.memory_space<vmem>>, %arg3: memref<1x8x64xbf16, #tpu.memory_space<vmem>>, %arg4: memref<9x4xf32, #tpu.memory_space<vmem>>, %arg5: memref<9x1xf32, #tpu.memory_space<vmem>>, %arg6: memref<8x8xf32, #tpu.memory_space<vmem>>, %arg7: memref<8x1xf32, #tpu.memory_space<vmem>>, %arg8: memref<8x8xf32, #tpu.memory_space<vmem>>, %arg9: memref<8x8xf32, #tpu.memory_space<vmem>>, %arg10: memref<8x16xf32, #tpu.memory_space<vmem>>, %arg11: memref<1x8x128xf32, #tpu.memory_space<vmem>>, %arg12: memref<8x8x16xf32, #tpu.memory_space<vmem>>, %arg13: memref<8x1xf32, #tpu.memory_space<vmem>>) attributes {dimension_semantics = [#tpu.dimension_semantics<parallel>, #tpu.dimension_semantics<arbitrary>], iteration_bounds = array<i64: 2, 2>, scalar_prefetch = 0 : i64, scratch_operands = 2 : i64, tpu.core_type = #tpu.core_type<tc>, window_params = [{transform_indices = @transform_0, window_bounds = array<i64: 1, 4, 128>}, {transform_indices = @transform_1, window_bounds = array<i64: 1, 8, 64>}, {pipeline_mode = #tpu.pipeline_mode<synchronous>, transform_indices = @transform_2, window_bounds = array<i64: 9, 4>}, {pipeline_mode = #tpu.pipeline_mode<synchronous>, transform_indices = @transform_3, window_bounds = array<i64: 9, 1>}, {pipeline_mode = #tpu.pipeline_mode<synchronous>, transform_indices = @transform_4, window_bounds = array<i64: 8, 8>}, {pipeline_mode = #tpu.pipeline_mode<synchronous>, transform_indices = @transform_5, window_bounds = array<i64: 8, 1>}, {pipeline_mode = #tpu.pipeline_mode<synchronous>, transform_indices = @transform_6, window_bounds = array<i64: 8, 8>}, {transform_indices = @transform_7, window_bounds = array<i64: 8, 8>}, {pipeline_mode = #tpu.pipeline_mode<synchronous>, transform_indices = @transform_8, window_bounds = array<i64: 8, 16>}, {transform_indices = @transform_9, window_bounds = array<i64: 1, 8, 128>}]} {
    %c0_i32 = arith.constant 0 : i32
    %0 = arith.cmpi eq, %arg1, %c0_i32 : i32
    %1 = arith.extui %0 : i1 to i32
    %c0_i32_0 = arith.constant 0 : i32
    %2 = arith.cmpi ne, %1, %c0_i32_0 : i32
    scf.if %2 {
      %c0_19 = arith.constant 0 : index
      %c0_20 = arith.constant 0 : index
      %c0_21 = arith.constant 0 : index
      %33 = vector.load %arg3[%c0_19, %c0_20, %c0_21] : memref<1x8x64xbf16, #tpu.memory_space<vmem>>, vector<1x8x64xbf16>
      %34 = vector.shape_cast %33 : vector<1x8x64xbf16> to vector<8x64xbf16>
      %35 = arith.extf %34 : vector<8x64xbf16> to vector<8x64xf32>
      %c0_22 = arith.constant 0 : index
      %c0_23 = arith.constant 0 : index
      %36 = vector.load %arg6[%c0_22, %c0_23] : memref<8x8xf32, #tpu.memory_space<vmem>>, vector<8x8xf32>
      %cst_24 = arith.constant dense<0.000000e+00> : vector<8x64xf32>
      %37 = tpu.matmul %36, %35, %cst_24 {dimension_numbers = #tpu.dot_dimension_numbers<[1], [0], [0], [1], [0, 0, 1, 1], [], []>} : vector<8x8xf32>, vector<8x64xf32>, vector<8x64xf32> -> vector<8x64xf32>
      %c0_25 = arith.constant 0 : index
      %c0_26 = arith.constant 0 : index
      %38 = vector.load %arg7[%c0_25, %c0_26] : memref<8x1xf32, #tpu.memory_space<vmem>>, vector<8x1xf32>
      %39 = vector.broadcast %38 : vector<8x1xf32> to vector<8x64xf32>
      %40 = arith.addf %37, %39 : vector<8x64xf32>
      %cst_27 = arith.constant dense<0.000000e+00> : vector<8xf32>
      %41 = vector.multi_reduction <add>, %40, %cst_27 [1] : vector<8x64xf32> to vector<8xf32>
      %42 = vector.shape_cast %41 : vector<8xf32> to vector<8x1xf32>
      %cst_28 = arith.constant 6.400000e+01 : f32
      %43 = vector.broadcast %cst_28 : f32 to vector<8x1xf32>
      %44 = arith.divf %42, %43 : vector<8x1xf32>
      %c0_29 = arith.constant 0 : index
      %c0_30 = arith.constant 0 : index
      %45 = vector.load %arg8[%c0_29, %c0_30] : memref<8x8xf32, #tpu.memory_space<vmem>>, vector<8x8xf32>
      %cst_31 = arith.constant dense<0.000000e+00> : vector<8x1xf32>
      %46 = tpu.matmul %45, %44, %cst_31 {dimension_numbers = #tpu.dot_dimension_numbers<[1], [0], [0], [1], [0, 0, 1, 1], [], []>} : vector<8x8xf32>, vector<8x1xf32>, vector<8x1xf32> -> vector<8x1xf32>
      %cst_32 = arith.constant 0.000000e+00 : f32
      %47 = vector.broadcast %cst_32 : f32 to vector<8x1xf32>
      %48 = arith.maximumf %46, %47 : vector<8x1xf32>
      %49 = arith.negf %48 : vector<8x1xf32>
      %50 = math.exp %49 : vector<8x1xf32>
      %cst_33 = arith.constant 1.000000e+00 : f32
      %51 = vector.broadcast %cst_33 : f32 to vector<8x1xf32>
      %52 = arith.addf %51, %50 : vector<8x1xf32>
      %53 = arith.divf %51, %52 : vector<8x1xf32>
      %c0_34 = arith.constant 0 : index
      %c0_35 = arith.constant 0 : index
      %54 = vector.load %arg13[%c0_34, %c0_35] : memref<8x1xf32, #tpu.memory_space<vmem>>, vector<8x1xf32>
      tpu.vector_store %arg13[%c0_34, %c0_35], %53 {strides = array<i32>} : memref<8x1xf32, #tpu.memory_space<vmem>>, vector<8x1xf32>,
      %55 = vector.shape_cast %40 : vector<8x64xf32> to vector<8x8x8xf32>
      %c0_36 = arith.constant 0 : index
      %c0_37 = arith.constant 0 : index
      %56 = vector.load %arg10[%c0_36, %c0_37] : memref<8x16xf32, #tpu.memory_space<vmem>>, vector<8x16xf32>
      %57 = vector.shape_cast %56 : vector<8x16xf32> to vector<1x8x16xf32>
      %58 = vector.broadcast %57 : vector<1x8x16xf32> to vector<8x8x16xf32>
      %cst_38 = arith.constant dense<0.000000e+00> : vector<8x8x16xf32>
      %59 = tpu.matmul %55, %58, %cst_38 {dimension_numbers = #tpu.dot_dimension_numbers<[2], [1], [1], [2], [0, 0, 0, 1, 1, 2], [0], [0]>} : vector<8x8x8xf32>, vector<8x8x16xf32>, vector<8x8x16xf32> -> vector<8x8x16xf32>
      %c0_39 = arith.constant 0 : index
      %c0_40 = arith.constant 0 : index
      %c0_41 = arith.constant 0 : index
      %60 = vector.load %arg12[%c0_39, %c0_40, %c0_41] : memref<8x8x16xf32, #tpu.memory_space<vmem>>, vector<8x8x16xf32>
      tpu.vector_store %arg12[%c0_39, %c0_40, %c0_41], %59 {strides = array<i32>} : memref<8x8x16xf32, #tpu.memory_space<vmem>>, vector<8x8x16xf32>,
    } else {
    }
    %c0 = arith.constant 0 : index
    %c0_1 = arith.constant 0 : index
    %c0_2 = arith.constant 0 : index
    %3 = vector.load %arg2[%c0, %c0_1, %c0_2] : memref<1x4x128xbf16, #tpu.memory_space<vmem>>, vector<1x4x128xbf16>
    %4 = vector.shape_cast %3 : vector<1x4x128xbf16> to vector<4x128xbf16>
    %5 = arith.extf %4 : vector<4x128xbf16> to vector<4x128xf32>
    %c0_3 = arith.constant 0 : index
    %c0_4 = arith.constant 0 : index
    %6 = vector.load %arg4[%c0_3, %c0_4] : memref<9x4xf32, #tpu.memory_space<vmem>>, vector<9x4xf32>
    %cst = arith.constant dense<0.000000e+00> : vector<9x128xf32>
    %7 = tpu.matmul %6, %5, %cst {dimension_numbers = #tpu.dot_dimension_numbers<[1], [0], [0], [1], [0, 0, 1, 1], [], []>} : vector<9x4xf32>, vector<4x128xf32>, vector<9x128xf32> -> vector<9x128xf32>
    %c0_5 = arith.constant 0 : index
    %c0_6 = arith.constant 0 : index
    %8 = vector.load %arg5[%c0_5, %c0_6] : memref<9x1xf32, #tpu.memory_space<vmem>>, vector<9x1xf32>
    %9 = vector.broadcast %8 : vector<9x1xf32> to vector<9x128xf32>
    %10 = arith.addf %7, %9 : vector<9x128xf32>
    %11 = vector.extract_strided_slice %10 {offsets = [0, 0], sizes = [8, 128], strides = [1, 1]} : vector<9x128xf32> to vector<8x128xf32>
    %12 = vector.extract_strided_slice %10 {offsets = [8, 0], sizes = [1, 128], strides = [1, 1]} : vector<9x128xf32> to vector<1x128xf32>
    %13 = arith.negf %12 : vector<1x128xf32>
    %14 = math.exp %13 : vector<1x128xf32>
    %cst_7 = arith.constant 1.000000e+00 : f32
    %15 = vector.broadcast %cst_7 : f32 to vector<1x128xf32>
    %16 = arith.addf %15, %14 : vector<1x128xf32>
    %17 = arith.divf %15, %16 : vector<1x128xf32>
    %c0_8 = arith.constant 0 : index
    %c0_9 = arith.constant 0 : index
    %18 = vector.load %arg9[%c0_8, %c0_9] : memref<8x8xf32, #tpu.memory_space<vmem>>, vector<8x8xf32>
    %19 = vector.shape_cast %18 : vector<8x8xf32> to vector<1x8x8xf32>
    %20 = vector.broadcast %19 : vector<1x8x8xf32> to vector<8x8x8xf32>
    %c0_10 = arith.constant 0 : index
    %c0_11 = arith.constant 0 : index
    %c0_12 = arith.constant 0 : index
    %21 = vector.load %arg12[%c0_10, %c0_11, %c0_12] : memref<8x8x16xf32, #tpu.memory_space<vmem>>, vector<8x8x16xf32>
    %cst_13 = arith.constant dense<0.000000e+00> : vector<8x8x16xf32>
    %22 = tpu.matmul %20, %21, %cst_13 {dimension_numbers = #tpu.dot_dimension_numbers<[2], [1], [1], [2], [0, 0, 0, 1, 1, 2], [0], [0]>} : vector<8x8x8xf32>, vector<8x8x16xf32>, vector<8x8x16xf32> -> vector<8x8x16xf32>
    %c0_14 = arith.constant 0 : index
    %c0_15 = arith.constant 0 : index
    %23 = vector.load %arg13[%c0_14, %c0_15] : memref<8x1xf32, #tpu.memory_space<vmem>>, vector<8x1xf32>
    %24 = vector.broadcast %23 : vector<8x1xf32> to vector<8x128xf32>
    %25 = arith.mulf %24, %11 : vector<8x128xf32>
    %26 = vector.shape_cast %22 : vector<8x8x16xf32> to vector<8x128xf32>
    %27 = vector.broadcast %17 : vector<1x128xf32> to vector<8x128xf32>
    %28 = arith.mulf %27, %26 : vector<8x128xf32>
    %29 = arith.addf %25, %28 : vector<8x128xf32>
    %c0_16 = arith.constant 0 : index
    %c0_17 = arith.constant 0 : index
    %c0_18 = arith.constant 0 : index
    %30 = vector.load %arg11[%c0_16, %c0_17, %c0_18] : memref<1x8x128xf32, #tpu.memory_space<vmem>>, vector<1x8x128xf32>
    %31 = vector.shape_cast %30 : vector<1x8x128xf32> to vector<8x128xf32>
    %32 = vector.shape_cast %29 : vector<8x128xf32> to vector<1x8x128xf32>
    tpu.vector_store %arg11[%c0_16, %c0_17, %c0_18], %32 {strides = array<i32>} : memref<1x8x128xf32, #tpu.memory_space<vmem>>, vector<1x8x128xf32>,
    return
  }
  func.func @transform_0(%arg0: i32, %arg1: i32) -> (i32, i32, i32) {
    %c0_i32 = arith.constant 0 : i32
    %c0_i32_0 = arith.constant 0 : i32
    return %arg0, %c0_i32, %arg1 : i32, i32, i32
  }
  func.func @transform_1(%arg0: i32, %arg1: i32) -> (i32, i32, i32) {
    %c0_i32 = arith.constant 0 : i32
    %c0_i32_0 = arith.constant 0 : i32
    %c0_i32_1 = arith.constant 0 : i32
    return %arg0, %c0_i32, %c0_i32_0 : i32, i32, i32
  }
  func.func @transform_2(%arg0: i32, %arg1: i32) -> (i32, i32) {
    %c0_i32 = arith.constant 0 : i32
    %c0_i32_0 = arith.constant 0 : i32
    %c0_i32_1 = arith.constant 0 : i32
    return %c0_i32, %c0_i32_0 : i32, i32
  }
  func.func @transform_3(%arg0: i32, %arg1: i32) -> (i32, i32) {
    %c0_i32 = arith.constant 0 : i32
    %c0_i32_0 = arith.constant 0 : i32
    %c0_i32_1 = arith.constant 0 : i32
    return %c0_i32, %c0_i32_0 : i32, i32
  }
  func.func @transform_4(%arg0: i32, %arg1: i32) -> (i32, i32) {
    %c0_i32 = arith.constant 0 : i32
    %c0_i32_0 = arith.constant 0 : i32
    %c0_i32_1 = arith.constant 0 : i32
    return %c0_i32, %c0_i32_0 : i32, i32
  }
  func.func @transform_5(%arg0: i32, %arg1: i32) -> (i32, i32) {
    %c0_i32 = arith.constant 0 : i32
    %c0_i32_0 = arith.constant 0 : i32
    %c0_i32_1 = arith.constant 0 : i32
    return %c0_i32, %c0_i32_0 : i32, i32
  }
  func.func @transform_6(%arg0: i32, %arg1: i32) -> (i32, i32) {
    %c0_i32 = arith.constant 0 : i32
    %c0_i32_0 = arith.constant 0 : i32
    %c0_i32_1 = arith.constant 0 : i32
    return %c0_i32, %c0_i32_0 : i32, i32
  }
  func.func @transform_7(%arg0: i32, %arg1: i32) -> (i32, i32) {
    %c0_i32 = arith.constant 0 : i32
    %c0_i32_0 = arith.constant 0 : i32
    return %arg1, %c0_i32 : i32, i32
  }
  func.func @transform_8(%arg0: i32, %arg1: i32) -> (i32, i32) {
    %c0_i32 = arith.constant 0 : i32
    %c0_i32_0 = arith.constant 0 : i32
    %c0_i32_1 = arith.constant 0 : i32
    return %c0_i32, %c0_i32_0 : i32, i32
  }
  func.func @transform_9(%arg0: i32, %arg1: i32) -> (i32, i32, i32) {
    %c0_i32 = arith.constant 0 : i32
    %c0_i32_0 = arith.constant 0 : i32
    return %arg0, %c0_i32, %arg1 : i32, i32, i32
  }
}

</mosaic_0001>

<bundles_post_ra>
// kernel: tpu_custom_call.1
= control target key start
LH: loop header
LB: loop body
LE: loop exit
PB: predicated region body
PF: predicated region fallthrough
CT: control target
= control target key end

     0   :  { %s3042_s0 = inlined_call_operand.vmem [shape: bf16[2,4,256], index: 0, kind: input, shape index: {}]   ;;  %s3043_s1 = inlined_call_operand.vmem [shape: bf16[2,8,64], index: 1, kind: input, shape index: {}]   ;;  %s3044_s2 = inlined_call_operand.vmem [shape: f32[9,4], index: 2, kind: input, shape index: {}]   ;;  %s3045_s3 = inlined_call_operand.vmem [shape: f32[9,1], index: 3, kind: input, shape index: {}]   ;;  %s3046_s4 = inlined_call_operand.vmem [shape: f32[8,8], index: 4, kind: input, shape index: {}]   ;;  %s3047_s5 = inlined_call_operand.vmem [shape: f32[8,1], index: 5, kind: input, shape index: {}]   ;;  %s3048_s6 = inlined_call_operand.vmem [shape: f32[8,8], index: 6, kind: input, shape index: {}]   ;;  %s3049_s7 = inlined_call_operand.vmem [shape: f32[16,8], index: 7, kind: input, shape index: {}]   ;;  %s3050_s8 = inlined_call_operand.vmem [shape: f32[8,16], index: 8, kind: input, shape index: {}]   ;;  %s3051_s9 = inlined_call_operand.hbm [shape: f32[2,8,256], index: 9, kind: output, shape index: {}]  }
   0x1   :  { %3063 = sst [smem:[#allocation16_spill]] %s3051_s9 }
   0x2   :  { %14 = vsyncpa [#allocation5], 0 }
   0x3   :  { %16 = vsyncpa [#allocation5 + $0x1], 0  ;;  %s2759_s30 = smov 0   ;;  %s2761_s10 = smov 0  }
   0x4   :  { %s2763_s11 = smov 0   ;;  %s2765_s12 = smov 0  }
   0x5   :  { %s2767_s13 = smov 0   ;;  %s2769_s14 = smov 0  }
   0x6   :  { %s2771_s15 = smov 0   ;;  %s2773_s16 = smov 0  }
   0x7 LB: > { %3064 = sst [smem:[#allocation7_spill]] %s2654_s30  ;;  %s2309_s17 = sadd.s32 4294967295, %s2682_s16   ;;  %s2682_s16 = sphi %s2773_s16, %s22_s16   ;;  %s2678_s15 = sphi %s2771_s15, %s3086_s15   ;;  %s2674_s14 = sphi %s2769_s14, %s3085_s14   ;;  %s2670_s13 = sphi %s2767_s13, %s3084_s13   ;;  %s2666_s12 = sphi %s2765_s12, %s3089_s12   ;;  %s2662_s11 = sphi %s2763_s11, %s3082_s11   ;;  %s2658_s10 = sphi %s2761_s10, %s3088_s10   ;;  %s2654_s30 = sphi %s2759_s30, %s3087_s30  }
   0x8   : > { %3065 = sst [smem:[#allocation8_spill]] %s2662_s11  ;;  %s2310_s18 = sadd.s32 4294967294, %s2682_s16  }
   0x9   : > { %3066 = sst [smem:[#allocation9_spill]] %s2674_s14  ;;  %s31_s19 = sadd.s32 1, %s2674_s14 }
   0xa   : > { %3067 = sst [smem:[#allocation10_spill]] %s2678_s15  ;;  %p32_p0 = scmp.ge.s32.totalorder %s31_s19, 2 }
   0xb   : > { %3068 = sst [smem:[#allocation11_spill]] %s2682_s16  ;;  %s34_s20 = sadd.s32 1, %s2678_s15 }
   0xc   : > { %p259_p1 = scmp.ne.s32.totalorder %s2662_s11, %s2658_s10  ;;  %p260_p2 = scmp.eq.s32.totalorder %s2309_s17, 3 }
   0xd   : > { %s3091_s19 = smov (%p32_p0, %s31_s19), 0  ;;  %s3093_s20 = smov (!%p32_p0, %s34_s20), %s2678_s15 }
   0xe   : > { %3069 = sst [smem:[#allocation12_spill]] %s3091_s19  ;;  %s245_s21 = ssub.s32 %s2674_s14, %s3091_s19 }
   0xf   : > { %p2810_p3 = por %p260_p2, %p259_p1  ;;  %p36_p4 = scmp.ge.s32.totalorder %s3093_s20, 2 }
  0x10   : > { %p265_p5 = scmp.ne.s32.totalorder %s2658_s10, %s2654_s30  ;;  %p266_p6 = scmp.eq.s32.totalorder %s2310_s18, 3 }
  0x11   : > { %p2313_p7 = scmp.ge.s32.totalorder %s2682_s16, 1  ;;  %s3095_s20 = smov (%p36_p4, %s3093_s20), 0 }
  0x12   : > { %3071 = sst [smem:[#allocation13_spill]] %s3095_s20  ;;  %p2819_p8 = por %p266_p6, %p265_p5 }
  0x13   : > { %p327_p9 = scmp.lt.s32.totalorder %s2682_s16, 5  ;;  %s244_s24 = ssub.s32 %s2678_s15, %s3095_s20 }
  0x14   : > { %s3072_s23 = scalar_select %p2819_p8, 1, 0 }
  0x15   : > { %s249_s25 = sadd.s32 1, %s2662_s11  ;;  %s246_s26 = sor.u32 %s245_s21, %s244_s24 }
  0x16   : > { %3073 = sst [smem:[#allocation14_spill]] %s3072_s23  ;;  %p328_p10 = pnand %p2313_p7, %p327_p9 }
  0x17   : > { %p247_p11 = scmp.eq.s32.totalorder %s246_s26, 0  ;;  %s3058_s28 = sand.u32 (!%p328_p10), 1, %s2658_s10  }
  0x18   : > { %331 = sbr.rel (%p328_p10) target bundleno = 1029 (0x405), region = 56  ;;  %p374_p12 = scmp.lt.s32.totalorder (!%p328_p10), %s2670_s13, 1 }
  0x19   : > { %s2828_s27 = scalar_select %p247_p11, %s2662_s11, %s249_s25  }
  0x1a   : > { %s2834_s29 = sshll.u32 (!%p328_p10), %s3058_s28, 3  ;;  %p376_p13 = scmp.lt.s32.totalorder (!%p328_p10), %s2666_s12, 1 }
  0x1b   : > { %3074 = sst [smem:[#allocation15_spill]] %s2828_s27  ;;  %s373_s9 = scalar_lea.vmem (!%p328_p10), [#allocation4], %s2834_s29 }
  0x1c   : > { %p2319_p0 = scmp.ne.s32.totalorder (!%p328_p10), %s2666_s12, 0 }
  0x1f   : > { %s375_s17 = scalar_select %p374_p12, %s2670_s13, 1 }
  0x20   : > { %s377_s18 = scalar_select %p376_p13, %s2666_s12, 1 }
  0x21   : > { %s2315_s21 = sshll.u32 %s375_s17, 1  ;;  %s2317_s24 = sshll.u32 %s375_s17, 2  ;;  %v2684_v1 = vmov (!%p2319_p0), 0.0   ;;  %vm2685_vm0 = vmmov (!%p2319_p0), 0   ;;  %v396_v3 = vld [vmem:[%s3046_s4] sm:$0xff] (!%p2319_p0)  ;;  %vm403_vm1 = vcmask (!%p2319_p0), 64512   ;;  %v593_v18 = vlaneseq (!%p2319_p0) }
  0x22   : > { %s379_s25 = sadd.s32 %s2315_s21, %s377_s18  ;;  %s385_s19 = scalar_lea.vmem %s3043_s1, %s2317_s24  ;;  %2387 = vmatprep.subr.mxu0 (!%p2319_p0), %v2684_v1  ;;  %2389 = vmatprep.mubr.msk.f32.mxu0 (!%p2319_p0), %vm2685_vm0, %v2684_v1  ;;  %v397_v4 = vld [vmem:[%s3047_s5] sm:$0xff] (!%p2319_p0)  ;;  %v2686_v5 = vmov (!%p2319_p0), 0   ;;  %vm477_vm2 = vcmask (!%p2319_p0), 523264   ;;  %v2694_v16 = vmov (!%p2319_p0), 1983009808   ;;  %vm1309_vm3 = vcmask (!%p2319_p0), 130048  }
  0x23   : > { %s2316_s15 = sshll.u32 %s379_s25, 1  ;;  %s2318_s14 = sshll.u32 %s377_s18, 3  ;;  %v394_v0 = vld [vmem:[%s385_s19] sm:$0xf] (!%p2319_p0)  ;;  %2577 = vset.pattern.permute.xlu0 (!%p2319_p0), %v2686_v5  ;;  %2392 = vmatprep.subr.mxu1 (!%p2319_p0), %v2684_v1  ;;  %v591_v17 = vunpack.c.l.s4 (!%p2319_p0), %v2694_v16  ;;  %v594_v21 = vshrl.u32 (!%p2319_p0), %v593_v18, 7  ;;  %vm564_vm4 = vcmask (!%p2319_p0), 7168  }
  0x24   : > { %s2845_s23 = scalar_lea.vmem %s3042_s0, %s2316_s15  ;;  %s2850_s16 = scalar_lea.vmem %s3049_s7, %s2318_s14  ;;  %v395_v2 = vunpack.c.l.bf16 (!%p2319_p0), %v394_v0  ;;  %400 = vperm.xlu0 (!%p2319_p0), %2577, %v397_v4   ;;  %2394 = vmatprep.mubr.msk.f32.mxu1 (!%p2319_p0), %vm2685_vm0, %v2684_v1  ;;  %v2882_v11 = vld [vmem:[%s3050_s8] sm:$0xff] (!%p2319_p0)  ;;  %v2695_v22 = vmov (!%p2319_p0), 1934713408  }
  0x25   : > { %393 = sbr.rel (%p2319_p0) target bundleno = 640 (0x280), region = 60  ;;  %s2687_s19 = smov (!%p2319_p0), 120   ;;  %v592_v20 = vunpack.c.0.s8 (!%p2319_p0), %v591_v17  ;;  %v655_v23 = vunpack.c.l.s4 (!%p2319_p0), %v2695_v22  ;;  %v483_v48 = vld [vmem:[%s3048_s6] sm:$0xff] (!%p2319_p0) }
  0x26   : > { %2388 = vmatpush3.msra.mxu0 (!%p2319_p0), %v395_v2  ;;  %s2688_s20 = smov (!%p2319_p0), 112   ;;  %s2689_s27 = smov (!%p2319_p0), 104  }
  0x27   : > { %2390 = vmatmul.mubr.msk.f32.vlgmr.msra.gmra.mrb[0].mxu0 (!%p2319_p0), %vm403_vm1, %v396_v3  ;;  %2397 = vmatprep.subr.mxu0 (!%p2319_p0), %v2684_v1  ;;  %s2690_s28 = smov (!%p2319_p0), 96   ;;  %s2691_s17 = smov (!%p2319_p0), 88   ;;  %v595_v26 = vsub.s32 (!%p2319_p0), %v592_v20, %v594_v21  ;;  %v656_v28 = vunpack.c.0.s8 (!%p2319_p0), %v655_v23 }
  0x28   : > { %2399 = vmatprep.mubr.msk.f32.mxu0 (!%p2319_p0), %vm2685_vm0, %v2684_v1  ;;  %s2692_s18 = smov (!%p2319_p0), 80   ;;  %2398 = vmatpush3.msra.mxu0 (!%p2319_p0), %v2882_v11  ;;  %s2693_s25 = smov (!%p2319_p0), 72  }
  0x29   : > { %2407 = vmatprep.subr.mxu0 (!%p2319_p0), %v2684_v1  ;;  %v659_v35 = vsub.s32 (!%p2319_p0), %v656_v28, %v594_v21 }
  0xa3   : > { %v401_v6 = vpop.permute.xlu0 %400 }
  0xfa   : > { %v473_v7 = vpop.f32.mrb[0].mxu0 }
  0xfb   : > { %v2870_v8 = vadd.f32 %v473_v7, %v401_v6  ;;  %v2391_v9 = vpop.f32.mrb[1].mxu0 }
  0xfd   : > { %567 = vrot.lane.b32.xlu1 %v2870_v8, %s2687_s19  ;;  %v478_v10 = vsel %vm477_vm2, %v2870_v8, 0.0 }
  0xfe   : > { %479 = vadd.xlane.f32.xlu0 %v478_v10 }
 0x101   : > { %570 = vrot.lane.b32.xlu1 %v2870_v8, %s2688_s20 }
 0x105   : > { %573 = vrot.lane.b32.xlu1 %v2870_v8, %s2689_s27 }
 0x109   : > { %576 = vrot.lane.b32.xlu1 %v2870_v8, %s2690_s28 }
 0x10d   : > { %579 = vrot.lane.b32.xlu1 %v2870_v8, %s2691_s17 }
 0x111   : > { %582 = vrot.lane.b32.xlu1 %v2870_v8, %s2692_s18 }
 0x115   : > { %585 = vrot.lane.b32.xlu1 %v2870_v8, %s2693_s25 }
 0x16f   : > { %v568_v12 = vpop.permute.xlu1 %567 }
 0x173   : > { %v571_v13 = vpop.permute.xlu1 %570 }
 0x174   : > { %v588_v27 = vcombine.low %v2870_v8, %v571_v13  ;;  %v589_v41 = vcombine.high %v2870_v8, %v571_v13 }
 0x176   : > { %v596_v32 = vrot.slane %v588_v27, %v595_v26  ;;  %v603_v53 = vrot.slane %v589_v41, %v595_v26 }
 0x177   : > { %v574_v14 = vpop.permute.xlu1 %573 }
 0x178   : > { %v604_v24 = vcombine.low %v568_v12, %v574_v14  ;;  %v605_v36 = vcombine.high %v568_v12, %v574_v14 }
 0x17a   : > { %v612_v29 = vrot.slane %v604_v24, %v595_v26  ;;  %v619_v46 = vrot.slane %v605_v36, %v595_v26 }
 0x17b   : > { %v577_v15 = vpop.permute.xlu1 %576 }
 0x17c   : > { %v652_v37 = vcombine.low %v596_v32, %v612_v29  ;;  %v653_v49 = vcombine.high %v596_v32, %v612_v29  ;;  %v668_v59 = vcombine.low %v603_v53, %v619_v46  ;;  %v669_v63 = vcombine.high %v603_v53, %v619_v46 }
 0x17e   : > { %v660_v50 = vrot.slane %v652_v37, %v659_v35  ;;  %v667_v58 = vrot.slane %v653_v49, %v659_v35  ;;  %v676_v0 = vrot.slane %v668_v59, %v659_v35  ;;  %v683_v5 = vrot.slane %v669_v63, %v659_v35 }
 0x17f   : > { %v580_v19 = vpop.permute.xlu1 %579 }
 0x183   : > { %v583_v25 = vpop.permute.xlu1 %582 }
 0x184   : > { %v620_v30 = vcombine.low %v577_v15, %v583_v25  ;;  %v621_v38 = vcombine.high %v577_v15, %v583_v25 }
 0x186   : > { %v628_v39 = vrot.slane %v620_v30, %v595_v26  ;;  %v635_v51 = vrot.slane %v621_v38, %v595_v26 }
 0x187   : > { %v586_v31 = vpop.permute.xlu1 %585 }
 0x188   : > { %v636_v33 = vcombine.low %v580_v19, %v586_v31  ;;  %v637_v34 = vcombine.high %v580_v19, %v586_v31 }
 0x18a   : > { %v644_v40 = vrot.slane %v636_v33, %v595_v26  ;;  %v651_v43 = vrot.slane %v637_v34, %v595_v26 }
 0x18b   : > { %v480_v42 = vpop.xlane.xlu0 %479 }
 0x18c   : > { %v684_v44 = vcombine.low %v628_v39, %v644_v40  ;;  %v685_v45 = vcombine.high %v628_v39, %v644_v40  ;;  %v482_v47 = vmul.f32 0.015625, %v480_v42  ;;  %v700_v55 = vcombine.low %v635_v51, %v651_v43 }
 0x18d   : > { %v701_v60 = vcombine.high %v635_v51, %v651_v43 }
 0x18e   : > { %v692_v52 = vrot.slane %v684_v44, %v659_v35  ;;  %2393 = vmatpush3.msra.mxu1 %v482_v47  ;;  %v699_v54 = vrot.slane %v685_v45, %v659_v35  ;;  %v708_v61 = vrot.slane %v700_v55, %v659_v35 }
 0x18f   : > { %2395 = vmatmul.mubr.msk.f32.vlgmr.msra.gmra.mrb[0].mxu1 %vm403_vm1, %v483_v48  ;;  %2402 = vmatprep.subr.mxu1 %v2684_v1  ;;  %v715_v3 = vrot.slane %v701_v60, %v659_v35 }
 0x190   : > { %v716_v56 = vcombine.low %v660_v50, %v692_v52  ;;  %v717_v57 = vcombine.high %v660_v50, %v692_v52  ;;  %2403 = vmatpush3.msra.mxu1 %v2882_v11  ;;  %2404 = vmatprep.mubr.msk.f32.mxu1 %vm2685_vm0, %v2684_v1  ;;  %v718_v62 = vcombine.low %v667_v58, %v699_v54 }
 0x191   : > { %2412 = vmatprep.subr.mxu1 %v2684_v1  ;;  %v719_v2 = vcombine.high %v667_v58, %v699_v54  ;;  %v720_v4 = vcombine.low %v676_v0, %v708_v61  ;;  %v721_v6 = vcombine.high %v676_v0, %v708_v61  ;;  %v722_v7 = vcombine.low %v683_v5, %v715_v3 }
 0x192   : > { %2400 = vmatmul.mubr.msk.f32.vlgmr.msra.gmra.mrb[2].mxu0 %vm403_vm1, %v716_v56  ;;  %v723_v8 = vcombine.high %v683_v5, %v715_v3 }
 0x193   : > { %2408 = vmatpush3.msra.mxu0 %v2882_v11  ;;  %2405 = vmatmul.mubr.msk.f32.vlgmr.msra.gmra.mrb[2].mxu1 %vm403_vm1, %v717_v57 }
 0x194   : > { %2409 = vmatprep.mubr.msk.f32.mxu0 %vm2685_vm0, %v2684_v1  ;;  %2414 = vmatprep.mubr.msk.f32.mxu1 %vm2685_vm0, %v2684_v1 }
 0x195   : > { %2413 = vmatpush3.msra.mxu1 %v2882_v11  ;;  %2417 = vmatprep.subr.mxu0 %v2684_v1 }
 0x196   : > { %2410 = vmatmul.mubr.msk.f32.vlgmr.msra.gmra.mrb[4].mxu0 %vm403_vm1, %v718_v62  ;;  %2422 = vmatprep.subr.mxu1 %v2684_v1 }
 0x197   : > { %2419 = vmatprep.mubr.msk.f32.mxu0 %vm2685_vm0, %v2684_v1  ;;  %2415 = vmatmul.mubr.msk.f32.vlgmr.msra.gmra.mrb[4].mxu1 %vm403_vm1, %v719_v2 }
 0x198   : > { %2418 = vmatpush3.msra.mxu0 %v2882_v11  ;;  %2424 = vmatprep.mubr.msk.f32.mxu1 %vm2685_vm0, %v2684_v1 }
 0x199   : > { %2423 = vmatpush3.msra.mxu1 %v2882_v11  ;;  %2427 = vmatprep.subr.mxu0 %v2684_v1 }
 0x19a   : > { %2420 = vmatmul.mubr.msk.f32.vlgmr.msra.gmra.mrb[6].mxu0 %vm403_vm1, %v720_v4  ;;  %2432 = vmatprep.subr.mxu1 %v2684_v1 }
 0x19b   : > { %2429 = vmatprep.mubr.msk.f32.mxu0 %vm2685_vm0, %v2684_v1  ;;  %2425 = vmatmul.mubr.msk.f32.vlgmr.msra.gmra.mrb[6].mxu1 %vm403_vm1, %v721_v6 }
 0x19c   : > { %2428 = vmatpush3.msra.mxu0 %v2882_v11  ;;  %2434 = vmatprep.mubr.msk.f32.mxu1 %vm2685_vm0, %v2684_v1 }
 0x19d   : > { %2433 = vmatpush3.msra.mxu1 %v2882_v11 }
 0x19e   : > { %2430 = vmatmul.mubr.msk.f32.vlgmr.msra.gmra.mrb[8].mxu0 %vm403_vm1, %v722_v7 }
 0x19f   : > { %2435 = vmatmul.mubr.msk.f32.vlgmr.msra.gmra.mrb[8].mxu1 %vm403_vm1, %v723_v8 }
 0x262   : > { %v553_v9 = vpop.f32.mrb[0].mxu1 }
 0x263   : > { %v557_v10 = vmax.f32 %v553_v9, 0.0  ;;  %v2396_v12 = vpop.f32.mrb[1].mxu1 }
 0x265   : > { %v794_v13 = vpop.f32.mrb[2].mxu0  ;;  %v2322_v14 = vmul.f32 -1.442695, %v557_v10 }
 0x266   : > { %1310 = vst.msk [vmem:[#allocation2] sm:$0xff] %vm1309_vm3, %v794_v13  ;;  %v2401_v15 = vpop.f32.mrb[3].mxu0  ;;  %v867_v16 = vpop.f32.mrb[2].mxu1 }
 0x267   : > { %2578 = vpow2.f32 %v2322_v14  ;;  %1311 = vst.msk [vmem:[#allocation2 + $0x8] sm:$0xff] %vm1309_vm3, %v867_v16  ;;  %v2406_v1 = vpop.f32.mrb[3].mxu1 }
 0x269   : > { %v940_v17 = vpop.f32.mrb[4].mxu0 }
 0x26a   : > { %1312 = vst.msk [vmem:[#allocation2 + $0x10] sm:$0xff] %vm1309_vm3, %v940_v17  ;;  %v2411_v11 = vpop.f32.mrb[5].mxu0  ;;  %v1013_v18 = vpop.f32.mrb[4].mxu1 }
 0x26b   : > { %1313 = vst.msk [vmem:[#allocation2 + $0x18] sm:$0xff] %vm1309_vm3, %v1013_v18  ;;  %v2416_v19 = vpop.f32.mrb[5].mxu1 }
 0x26d   : > { %v1086_v20 = vpop.f32.mrb[6].mxu0 }
 0x26e   : > { %1314 = vst.msk [vmem:[#allocation2 + $0x20] sm:$0xff] %vm1309_vm3, %v1086_v20  ;;  %v2421_v21 = vpop.f32.mrb[7].mxu0  ;;  %v1159_v22 = vpop.f32.mrb[6].mxu1 }
 0x26f   : > { %1315 = vst.msk [vmem:[#allocation2 + $0x28] sm:$0xff] %vm1309_vm3, %v1159_v22  ;;  %v2426_v23 = vpop.f32.mrb[7].mxu1 }
 0x271   : > { %v1232_v24 = vpop.f32.mrb[8].mxu0  ;;  %v2579_v25 = vpop.eup %2578 }
 0x272   : > { %1316 = vst.msk [vmem:[#allocation2 + $0x30] sm:$0xff] %vm1309_vm3, %v1232_v24  ;;  %v2431_v26 = vpop.f32.mrb[9].mxu0  ;;  %v561_v27 = vadd.f32 1.0, %v2579_v25  ;;  %v1305_v28 = vpop.f32.mrb[8].mxu1 }
 0x273   : > { %1317 = vst.msk [vmem:[#allocation2 + $0x38] sm:$0xff] %vm1309_vm3, %v1305_v28  ;;  %v2436_v29 = vpop.f32.mrb[9].mxu1 }
 0x274   : > { %2580 = vrcp.f32 %v561_v27 }
 0x27e   : > { %v2581_v30 = vpop.eup %2580 }
 0x27f   : > { %565 = vst.msk [vmem:[#allocation3] sm:$0xff] %vm564_vm4, %v2581_v30 }
 0x280 PF: > { %v1318_v31 = vld [vmem:[%s2845_s23] sm:$0x3]  ;;  %vm1341_vm5 = vcmask 1043456   ;;  %vm1334_vm6 = vcmask 31744   ;;  %v2696_v34 = vmov 0.0   ;;  %vm1435_vm7 = vcmask 64512  }
 0x281   : > { %v1320_v32 = vld [vmem:[%s3044_s2] sm:$0xff]  ;;  %v1319_v33 = vunpack.c.l.bf16 %v1318_v31  ;;  %2442 = vmatprep.subr.mxu1 %v2696_v34  ;;  %v1321_v37 = vld [vmem:[%s3044_s2 + $0x8] sm:$0x1]  ;;  %vm2697_vm8 = vmmov 0   ;;  %v1429_v39 = vld [vmem:[#allocation2 + $0x10] sm:$0xff]  ;;  %v2698_v46 = vmov 0   ;;  %v2011_v53 = vlaneseq }
 0x282   : > { %2439 = vmatprep.mubr.msk.f32.mxu0 %vm1334_vm6, %v1320_v32  ;;  %v1427_v35 = vld [vmem:[#allocation2] sm:$0xff]  ;;  %2444 = vmatprep.mubr.msk.f32.mxu1 %vm2697_vm8, %v2696_v34  ;;  %v1428_v38 = vld [vmem:[#allocation2 + $0x8] sm:$0xff]  ;;  %v1430_v40 = vld [vmem:[#allocation2 + $0x18] sm:$0xff]  ;;  %v2699_v51 = vmov 1983009808   ;;  %s2701_s28 = smov 32  }
 0x283   : > { %v1426_v36 = vld [vmem:[%s2850_s16] sm:$0xff]  ;;  %2443 = vmatpush3.msra.mxu1 %v1427_v35  ;;  %2437 = vmatprep.subr.msk.mxu0 %vm1341_vm5, %v1319_v33  ;;  %v1432_v42 = vld [vmem:[#allocation2 + $0x28] sm:$0xff]  ;;  %v1433_v43 = vld [vmem:[#allocation2 + $0x30] sm:$0xff]  ;;  %v2009_v52 = vunpack.c.l.s4 %v2699_v51  ;;  %v2972_v61 = vshrl.u32 %v2011_v53, 7  ;;  %v2700_v12 = vmov 1934713408  }
 0x284   : > { %2445 = vmatmul.mubr.msk.f32.vlgmr.msra.gmra.mrb[0].mxu1 %vm1435_vm7, %v1426_v36  ;;  %2438 = vmatpush3.msk.msra.mxu0 %vm1341_vm5, %v1319_v33  ;;  %v1431_v41 = vld [vmem:[#allocation2 + $0x20] sm:$0xff]  ;;  %v1434_v44 = vld [vmem:[#allocation2 + $0x38] sm:$0xff]  ;;  %v1323_v45 = vld [vmem:[%s3045_s3 + $0x8] sm:$0x1]  ;;  %v2073_v13 = vunpack.c.l.s4 %v2700_v12  ;;  %s2702_s17 = smov 16   ;;  %s2703_s18 = smov 64  }
 0x285   : > { %2452 = vmatprep.subr.mxu1 %v2696_v34  ;;  %2440 = vmatmul.mubr.msk.f32.vlgmr.msra.gmra.mrb[0].mxu0 %vm1334_vm6, %v1321_v37  ;;  %v1322_v48 = vld [vmem:[%s3045_s3] sm:$0xff]  ;;  %v2010_v60 = vunpack.c.0.s8 %v2009_v52  ;;  %s2704_s21 = smov 48   ;;  %s2705_s24 = smov 96   ;;  %vm2170_vm9 = vcmask 130048   ;;  %vm2172_vm10 = vcmask 261120   ;;  %vm2174_vm11 = vcmask 392192  }
 0x286   : > { %2447 = vmatprep.subr.mxu0 %v2696_v34  ;;  %2449 = vmatprep.mubr.msk.f32.mxu0 %vm2697_vm8, %v2696_v34  ;;  %v1999_v47 = vld [vmem:[#allocation3] sm:$0xff]  ;;  %v2074_v26 = vunpack.c.0.s8 %v2073_v13  ;;  %s2706_s25 = smov 80   ;;  %s2707_s26 = smov 112   ;;  %vm2176_vm12 = vcmask 523264   ;;  %vm2178_vm13 = vcmask 654336   ;;  %vm2180_vm14 = vcmask 785408  }
 0x287   : > { %2448 = vmatpush3.msra.mxu0 %v1428_v38  ;;  %2453 = vmatpush3.msra.mxu1 %v1429_v39  ;;  %v2013_v4 = vsub.s32 %v2010_v60, %v2972_v61  ;;  %s2344_s11 = sshll.u32 %s2670_s13, 1  ;;  %vm2182_vm15 = vcmask 916480   ;;  %s2207_s14 = sshll.u32 %s373_s9, 4  ;;  %s2987_s14 = int_to_ptr.vmem [resolvable:$true] %s2207_s14 }
 0x288   : > { %2454 = vmatprep.mubr.msk.f32.mxu1 %vm2697_vm8, %v2696_v34  ;;  %2457 = vmatprep.subr.mxu0 %v2696_v34  ;;  %v2077_v33 = vsub.s32 %v2074_v26, %v2972_v61  ;;  %s2203_s15 = sadd.s32 %s2666_s12, %s2344_s11  ;;  %s3075_s16 = sld [smem:[#allocation16_spill]] }
 0x289   : > { %2455 = vmatmul.mubr.msk.f32.vlgmr.msra.gmra.mrb[2].mxu1 %vm1435_vm7, %v1426_v36  ;;  %2450 = vmatmul.mubr.msk.f32.vlgmr.msra.gmra.mrb[2].mxu0 %vm1435_vm7, %v1426_v36  ;;  %s2345_s30 = sshll.u32 %s2203_s15, 7  ;;  %s3077_s12 = sand.u32 1, %s2658_s10  }
 0x28a   : > { %2462 = vmatprep.subr.mxu1 %v2696_v34  ;;  %2458 = vmatpush3.msra.mxu0 %v1430_v40  ;;  %s2192_s27 = scalar_lea.sflag [#allocation5], %s3077_s12 }
 0x28b   : > { %2459 = vmatprep.mubr.msk.f32.mxu0 %vm2697_vm8, %v2696_v34  ;;  %2463 = vmatpush3.msra.mxu1 %v1431_v41 }
 0x28c   : > { %2464 = vmatprep.mubr.msk.f32.mxu1 %vm2697_vm8, %v2696_v34  ;;  %2467 = vmatprep.subr.mxu0 %v2696_v34 }
 0x28d   : > { %2465 = vmatmul.mubr.msk.f32.vlgmr.msra.gmra.mrb[4].mxu1 %vm1435_vm7, %v1426_v36  ;;  %2460 = vmatmul.mubr.msk.f32.vlgmr.msra.gmra.mrb[4].mxu0 %vm1435_vm7, %v1426_v36 }
 0x28e   : > { %2472 = vmatprep.subr.mxu1 %v2696_v34  ;;  %2468 = vmatpush3.msra.mxu0 %v1432_v42  ;;  %s3076_s23 = smov %s3075_s16  ;;  %s2985_s20 = scalar_lea.hbm %s3075_s16, %s2345_s30 }
 0x28f   : > { %2469 = vmatprep.mubr.msk.f32.mxu0 %vm2697_vm8, %v2696_v34  ;;  %2473 = vmatpush3.msra.mxu1 %v1433_v43 }
 0x290   : > { %2474 = vmatprep.mubr.msk.f32.mxu1 %vm2697_vm8, %v2696_v34  ;;  %2477 = vmatprep.subr.mxu0 %v2696_v34 }
 0x291   : > { %2475 = vmatmul.mubr.msk.f32.vlgmr.msra.gmra.mrb[6].mxu1 %vm1435_vm7, %v1426_v36  ;;  %2470 = vmatmul.mubr.msk.f32.vlgmr.msra.gmra.mrb[6].mxu0 %vm1435_vm7, %v1426_v36 }
 0x292   : > { %2582 = vset.pattern.permute.xlu0 %v2698_v46  ;;  %2478 = vmatpush3.msra.mxu0 %v1434_v44 }
 0x293   : > { %2479 = vmatprep.mubr.msk.f32.mxu0 %vm2697_vm8, %v2696_v34  ;;  %1331 = vperm.xlu0 %2582, %v1323_v45  }
 0x294   : > { %2583 = vset.pattern.permute.xlu1 %v2698_v46 }
 0x295   : > { %2002 = vperm.xlu1 %2583, %v1999_v47   ;;  %2480 = vmatmul.mubr.msk.f32.vlgmr.msra.gmra.mrb[8].mxu0 %vm1435_vm7, %v1426_v36 }
 0x297   : > { %1326 = vperm.xlu0 %2582, %v1322_v48  }
 0x312   : > { %v1332_v54 = vpop.permute.xlu0 %1331 }
 0x357   : > { %v1505_v49 = vpop.f32.mrb[0].mxu1 }
 0x358   : > { %v2446_v50 = vpop.f32.mrb[1].mxu1  ;;  %v2441_v55 = vpop.f32.mrb[0].mxu0 }
 0x359   : > { %v1417_v56 = vadd.f32 %v2441_v55, %v1332_v54  ;;  %v2970_v57 = vpop.f32.mrb[1].mxu0  ;;  %v2186_v50 = vsub.s32 0, %v2972_v61  ;;  %v1327_v61 = vpop.permute.xlu0 %1326 }
 0x35a   : > { %v1412_v13 = vadd.f32 %v2970_v57, %v1327_v61 }
 0x35b   : > { %v2334_v58 = vmul.f32 -1.442695, %v1417_v56 }
 0x35c   : > { %v1645_v59 = vpop.f32.mrb[2].mxu1  ;;  %v1575_v62 = vpop.f32.mrb[2].mxu0 }
 0x35d   : > { %v2006_v63 = vcombine.low %v1505_v49, %v1645_v59  ;;  %v2007_v0 = vcombine.high %v1505_v49, %v1645_v59  ;;  %v2456_v2 = vpop.f32.mrb[3].mxu1  ;;  %2584 = vpow2.f32 %v2334_v58  ;;  %v2451_v3 = vpop.f32.mrb[3].mxu0 }
 0x35f   : > { %v2014_v14 = vrot.slane %v2006_v63, %v2013_v4  ;;  %v2021_v15 = vrot.slane %v2007_v0, %v2013_v4  ;;  %v2003_v63 = vpop.permute.xlu1 %2002 }
 0x360   : > { %v1785_v5 = vpop.f32.mrb[4].mxu1  ;;  %v1715_v6 = vpop.f32.mrb[4].mxu0 }
 0x361   : > { %v2466_v7 = vpop.f32.mrb[5].mxu1  ;;  %v2022_v8 = vcombine.low %v1575_v62, %v1715_v6  ;;  %v2023_v9 = vcombine.high %v1575_v62, %v1715_v6  ;;  %v2461_v10 = vpop.f32.mrb[5].mxu0 }
 0x363   : > { %v2030_v16 = vrot.slane %v2022_v8, %v2013_v4  ;;  %v2037_v1 = vrot.slane %v2023_v9, %v2013_v4 }
 0x364   : > { %v1925_v17 = vpop.f32.mrb[6].mxu1  ;;  %v1855_v11 = vpop.f32.mrb[6].mxu0 }
 0x365   : > { %v2038_v18 = vcombine.low %v1785_v5, %v1925_v17  ;;  %v2039_v19 = vcombine.high %v1785_v5, %v1925_v17  ;;  %v2476_v20 = vpop.f32.mrb[7].mxu1  ;;  %v2070_v21 = vcombine.low %v2014_v14, %v2030_v16  ;;  %v2071_v22 = vcombine.high %v2014_v14, %v2030_v16  ;;  %v2471_v25 = vpop.f32.mrb[7].mxu0 }
 0x366   : > { %v2086_v23 = vcombine.low %v2021_v15, %v2037_v1  ;;  %v2087_v24 = vcombine.high %v2021_v15, %v2037_v1  ;;  %v2005_v1 = vmul.f32 %v2003_v63, %v1412_v13 }
 0x367   : > { %v2585_v27 = vpop.eup %2584  ;;  %v2046_v34 = vrot.slane %v2038_v18, %v2013_v4  ;;  %v2053_v35 = vrot.slane %v2039_v19, %v2013_v4  ;;  %v2085_v42 = vrot.slane %v2071_v22, %v2077_v33  ;;  %v2078_v43 = vrot.slane %v2070_v21, %v2077_v33 }
 0x368   : > { %v1423_v28 = vadd.f32 1.0, %v2585_v27  ;;  %v1995_v29 = vpop.f32.mrb[8].mxu0  ;;  %v2094_v44 = vrot.slane %v2086_v23, %v2077_v33  ;;  %v2101_v49 = vrot.slane %v2087_v24, %v2077_v33 }
 0x369   : > { %v2054_v30 = vcombine.low %v1855_v11, %v1995_v29  ;;  %v2055_v31 = vcombine.high %v1855_v11, %v1995_v29  ;;  %v2481_v32 = vpop.f32.mrb[9].mxu0 }
 0x36a   : > { %2586 = vrcp.f32 %v1423_v28 }
 0x36b   : > { %v2062_v36 = vrot.slane %v2054_v30, %v2013_v4  ;;  %v2069_v37 = vrot.slane %v2055_v31, %v2013_v4 }
 0x36d   : > { %v2102_v38 = vcombine.low %v2046_v34, %v2062_v36  ;;  %v2103_v39 = vcombine.high %v2046_v34, %v2062_v36  ;;  %v2118_v40 = vcombine.low %v2053_v35, %v2069_v37  ;;  %v2119_v41 = vcombine.high %v2053_v35, %v2069_v37 }
 0x36f   : > { %v2117_v45 = vrot.slane %v2103_v39, %v2077_v33  ;;  %v2110_v46 = vrot.slane %v2102_v38, %v2077_v33  ;;  %v2126_v47 = vrot.slane %v2118_v40, %v2077_v33  ;;  %v2133_v48 = vrot.slane %v2119_v41, %v2077_v33 }
 0x371   : > { %v2136_v51 = vcombine.low %v2085_v42, %v2117_v45  ;;  %v2135_v52 = vcombine.high %v2078_v43, %v2110_v46  ;;  %v2138_v53 = vcombine.low %v2094_v44, %v2126_v47  ;;  %v2137_v54 = vcombine.high %v2085_v42, %v2117_v45 }
 0x372   : > { %v2140_v55 = vcombine.low %v2101_v49, %v2133_v48  ;;  %v2139_v56 = vcombine.high %v2094_v44, %v2126_v47  ;;  %v2141_v58 = vcombine.high %v2101_v49, %v2133_v48  ;;  %v2134_v59 = vcombine.low %v2078_v43, %v2110_v46 }
 0x373   : > { %2147 = vrot.lane.b32.xlu0 %v2136_v51, %s2701_s28  ;;  %2143 = vrot.lane.b32.xlu1 %v2135_v52, %s2702_s17  ;;  %s2588_s28 = scalar_lea.vmem %s2987_s14, 128  ;;  %s2708_s17 = smov [#allocation4]  }
 0x374   : > { %v2587_v60 = vpop.eup %2586  ;;  %p2589_p1 = scmp.ne.s32.totalorder %s2987_s14, %s2588_s28 }
 0x375   : > { %v2187_v62 = vrot.slane %v2587_v60, %v2186_v50 }
 0x376   : > { %p2590_p2 = pnand %p2589_p1, %p2810_p3 }
 0x377   : > { %2155 = vrot.lane.b32.xlu0 %v2138_v53, %s2703_s18  ;;  %2151 = vrot.lane.b32.xlu1 %v2137_v54, %s2704_s21  ;;  %s2592_s18 = sshll.u32 %s2708_s17, 4  ;;  %s2593_s18 = int_to_ptr.vmem [resolvable:$false] %s2592_s18 }
 0x378   : > { %p2591_p4 = pneg %p2590_p2  ;;  %s2594_s21 = scalar_lea.vmem %s2593_s18, 256 }
 0x379   : > { %p2595_p5 = scmp.lt.s32.totalorder %s2987_s14, %s2593_s18  ;;  %p2596_p6 = scmp.lt.s32.totalorder %s2594_s21, %s2588_s28 }
 0x37b   : > { %2163 = vrot.lane.b32.xlu0 %v2140_v55, %s2705_s24  ;;  %2159 = vrot.lane.b32.xlu1 %v2139_v56, %s2706_s25  ;;  %p2597_p7 = por %p2596_p6, %p2595_p5 }
 0x37d   : > { %p2598_p9 = pnand %p2597_p7, %p2591_p4 }
 0x37f   : > { %2167 = vrot.lane.b32.xlu1 %v2141_v58, %s2707_s26 }
 0x3e5   : > { %v2148_v0 = vpop.permute.xlu0 %2147  ;;  %v2144_v2 = vpop.permute.xlu1 %2143 }
 0x3e6   : > { %v2171_v3 = vsel %vm2170_vm9, %v2134_v59, %v2144_v2 }
 0x3e7   : > { %v2173_v6 = vsel %vm2172_vm10, %v2171_v3, %v2148_v0 }
 0x3e9   : > { %v2156_v4 = vpop.permute.xlu0 %2155  ;;  %v2152_v5 = vpop.permute.xlu1 %2151 }
 0x3ea   : > { %v2175_v7 = vsel %vm2174_vm11, %v2173_v6, %v2152_v5 }
 0x3eb   : > { %v2177_v9 = vsel %vm2176_vm12, %v2175_v7, %v2156_v4 }
 0x3ed   : > { %v2160_v8 = vpop.permute.xlu1 %2159  ;;  %v2164_v10 = vpop.permute.xlu0 %2163 }
 0x3ee   : > { %v2179_v12 = vsel %vm2178_vm13, %v2177_v9, %v2160_v8 }
 0x3ef   : > { %v2181_v15 = vsel %vm2180_vm14, %v2179_v12, %v2164_v10 }
 0x3f1   : > { %v2168_v14 = vpop.permute.xlu1 %2167 }
 0x3f2   : > { %v2183_v16 = vsel %vm2182_vm15, %v2181_v15, %v2168_v14 }
 0x3f3   : > { %v2188_v17 = vmul.f32 %v2187_v62, %v2183_v16 }
 0x3f5   : > { %v2189_v11 = vadd.f32 %v2188_v17, %v2005_v1 }
 0x3f7   : > { %2190 = vst [vmem:[%s373_s9] sm:$0xff] %v2189_v11 }
 0x3f8   : > { %2601 = shalt.err (!%p2598_p9)
}
 0x3f9   : > { %s2602_s9 = scalar_lea.hbm %s2985_s20, 128  ;;  %s2606_s25 = scalar_lea.hbm %s3076_s23, 512 }
 0x3fa   : > { %p2603_p10 = scmp.ne.s32.totalorder %s2985_s20, %s2602_s9  ;;  %p2607_p13 = scmp.lt.u32.totalorder %s2985_s20, %s3076_s23 }
 0x3fb   : > { %p2608_p0 = scmp.lt.u32.totalorder %s2606_s25, %s2602_s9  ;;  %p2610_p2 = scmp.lt.u32.totalorder %s2602_s9, %s2985_s20 }
 0x3fc   : > { %p2604_p11 = pnand %p2603_p10, %p2810_p3 }
 0x3fd   : > { %p2609_p1 = por %p2608_p0, %p2607_p13 }
 0x3fe   : > { %p2605_p12 = pneg %p2604_p11 }
 0x3ff   : > { %p2611_p4 = por %p2610_p2, %p2609_p1 }
 0x401   : > { %p2612_p5 = pnand %p2611_p4, %p2605_p12 }
 0x403   : > { %2615 = shalt.err (!%p2612_p5)
}
 0x404   : > { %2482 = dma.vmem_to_hbm [thread:$0]  (%p2810_p3), %s2987_s14, 128, %s2985_s20, %s2192_s27  }
 0x405 PF: > { %s3078_s15 = sld [smem:[#allocation11_spill]]  ;;  %s3079_s30 = sld [smem:[#allocation7_spill]] }
 0x40b   : > { %p2488_p6 = scmp.ge.s32.totalorder %s3078_s15, 2  ;;  %s2219_s19 = sand.u32 1, %s3079_s30  }
 0x40c   : > { %s2220_s16 = scalar_lea.sflag [#allocation5], %s2219_s19 }
 0x40d   : > { %p2485_p7 = pnand %p2488_p6, %p2819_p8 }
 0x40f   : > { %2649 = dma.done.wait (!%p2485_p7), %s2220_s16, 128  }
 0x410   : > { %2651 = vsyncadd (!%p2485_p7), %s2220_s16, 4294967168  ;;  %s22_s16 = sadd.s32 1, %s3078_s15   ;;  %s3081_s12 = sld [smem:[#allocation8_spill]] }
 0x411   : > { %p19_p9 = scmp.ge.s32.totalorder %s22_s16, 6   ;;  %s3082_s11 = sld [smem:[#allocation15_spill]] }
 0x412   : > { %s3083_s22 = sld [smem:[#allocation9_spill]]  ;;  %s3084_s13 = sld [smem:[#allocation10_spill]] }
 0x413   : > { %s3085_s14 = sld [smem:[#allocation12_spill]]  ;;  %s3086_s15 = sld [smem:[#allocation13_spill]] }
 0x414   : > { %s3087_s30 = smov %s2658_s10  ;;  %21 = sbr.rel (!%p19_p9) target bundleno = 7 (0x7), region = 101 }
 0x416   : > { %s3088_s10 = smov %s3081_s12 }
 0x418   : > { %s3089_s12 = smov %s3083_s22 }
 0x41b   :  { %2225 = vsyncpa [#allocation5], 1 }
 0x41c   :  { %2227 = vsyncpa [#allocation5 + $0x1], 1 }

</bundles_post_ra>
